<compile_context>
chip_gen: v5e
topology: v5e:2x2
jax: 0.10.0
libtpu: 0.0.40
codegen_flags: <defaults>
</compile_context>

<pallas_src>
import functools

import jax
import jax.numpy as jnp
from jax import lax
from jax.experimental import pallas as pl
from jax.experimental.pallas import tpu as pltpu


def _cross_attention_kernel(x_ref, k_ref, v_ref,
                            wq_ref, bq_ref, wo_ref, bo_ref,
                            out_ref, o_scratch,
                            *, num_heads, head_dim, len_k):
    """Grid = (batch, q_tile); heads fused inside the kernel body."""
    H, D = num_heads, head_dim

    x = x_ref[0]                                      # (TQ, C)       bf16
    k = k_ref[0]                                      # (Lk_pad, H*D) bf16
    v = v_ref[0]                                      # (Lk_pad, H*D) bf16
    lk_pad = k.shape[0]

    # Fused-head Q projection (the score scale is pre-folded into Wq/bq by the
    # wrapper); f32 accumulate, then back to bf16 for the attention matmuls.
    q = jnp.dot(x, wq_ref[...], preferred_element_type=jnp.float32) + bq_ref[...]
    q = q.astype(jnp.bfloat16)                        # (TQ, H*D)

    # Additive mask for zero-padded key columns (computed once, f32).
    if lk_pad > len_k:
        col = lax.broadcasted_iota(jnp.int32, (1, lk_pad), 1)
        key_bias = jnp.where(col < len_k, 0.0, -1e9).astype(jnp.float32)
    else:
        key_bias = None

    qk_dims = (((1,), (1,)), ((), ()))                # contract last dims, no k.T

    # TODO(synk): if the Mosaic dump shows per-head relayout copies from the
    # lane slices below (D not a multiple of 128), stage q/k/v once into
    # (H, ., D)-shaped VMEM scratch and index the leading axis instead.
    for h in range(H):                                # static unroll; H is small
        sl = slice(h * D, (h + 1) * D)
        s = lax.dot_general(q[:, sl], k[:, sl], qk_dims,
                            preferred_element_type=jnp.float32)   # (TQ, Lk_pad)
        if key_bias is not None:
            s = s + key_bias

        # Numerically stable softmax over keys, in f32.
        s_max = jnp.max(s, axis=-1, keepdims=True)
        p = jnp.exp(s - s_max)
        denom = jnp.sum(p, axis=-1, keepdims=True)
        p = p * pl.reciprocal(denom, approx=True)
        # TODO(synk): reference calls self.dropout which is never defined in
        # __init__; treated as identity here.

        o_scratch[:, sl] = jnp.dot(p.astype(jnp.bfloat16), v[:, sl],
                                   preferred_element_type=jnp.float32
                                   ).astype(jnp.bfloat16)

    # Single output projection over the full H*D contraction; bias added once.
    out = (jnp.dot(o_scratch[...], wo_ref[...],
                   preferred_element_type=jnp.float32) + bo_ref[...])
    out_ref[0] = out.astype(out_ref.dtype)


def _vmem_estimate(q_tile, C, HD, lk_pad):
    """Rough per-step VMEM footprint in bytes (conservative)."""
    bf, f4 = 2, 4
    blocks = (2 * q_tile * C * bf            # x tile, double-buffered
              + 2 * q_tile * C * bf          # out tile, double-buffered
              + 2 * 2 * lk_pad * HD * bf)    # K + V blocks, double-buffered
    weights = 2 * (C * HD * bf + HD * C * bf + HD * f4 + C * f4)
    temps = (q_tile * HD * (f4 + bf)         # q f32 + bf16 copy
             + 2 * q_tile * lk_pad * f4      # scores + probabilities
             + q_tile * HD * bf              # o_scratch slab
             + q_tile * C * f4)              # output-projection accumulator
    return blocks + weights + temps


def cross_attention(x, embeds, params, *, num_heads, head_dim, q_tile=None):
    if embeds is None:
        embeds = x
    B, Lq, C = x.shape
    _, Lk, _ = embeds.shape
    H, D = num_heads, head_dim
    HD = H * D
    inv_scale = float(D) ** 0.5              # == 1 / self.scale (folded into Wq/bq)

    # ---- parameter / input prep (glue, plain JAX) ---------------------------
    wq = (params["wq"] * inv_scale).astype(jnp.bfloat16)             # (C, H*D)
    bq = (params["bq"] * inv_scale).reshape(1, HD).astype(jnp.float32)
    wo = params["wo"].astype(jnp.bfloat16)                           # (H*D, C)
    bo = params["bo"].reshape(1, C).astype(jnp.float32)

    # K/V projections computed once per batch here (bf16) instead of being
    # recomputed for every query tile inside the kernel.
    k = (embeds @ params["wk"] + params["bk"]).astype(jnp.bfloat16)  # (B, Lk, H*D)
    v = (embeds @ params["wv"] + params["bv"]).astype(jnp.bfloat16)

    # Zero-pad the key axis up to a multiple of 128 (dense softmax vregs,
    # full-depth PV contraction); padded columns are masked in-kernel.
    lk_pad = max(128, ((Lk + 127) // 128) * 128)
    if lk_pad != Lk:
        pad = ((0, 0), (0, lk_pad - Lk), (0, 0))
        k = jnp.pad(k, pad)
        v = jnp.pad(v, pad)

    x_bf = x.astype(jnp.bfloat16)

    # ---- generation-aware tiling / VMEM budget ------------------------------
    try:
        vmem_cap = int(pltpu.get_tpu_info().vmem_capacity_bytes)
    except Exception:                         # conservative default (v7x-like)
        vmem_cap = 64 * 1024 * 1024
    if vmem_cap >= 128 * 1024 * 1024:         # v5e / v6e: 128 MiB VMEM
        limit_cap, max_tile = 100 * 1024 * 1024, 1024
    else:                                     # v7x: 64 MiB VMEM per core
        limit_cap, max_tile = 48 * 1024 * 1024, 512

    if q_tile is None:
        budget = int(0.7 * limit_cap)
        cands = [t for t in (1024, 512, 256, 128, 64, 32, 16, 8) if t <= max_tile]
        fitting = [t for t in cands
                   if Lq % t == 0 and _vmem_estimate(t, C, HD, lk_pad) <= budget]
        dividing = [t for t in cands if Lq % t == 0]
        q_tile = fitting[0] if fitting else (dividing[0] if dividing else Lq)
    assert Lq % q_tile == 0, "q_tile must divide Lq"
    n_q_tiles = Lq // q_tile

    est = _vmem_estimate(q_tile, C, HD, lk_pad)
    vmem_limit = int(min(limit_cap, max(32 * 1024 * 1024, 2 * est)))

    kernel = functools.partial(_cross_attention_kernel,
                               num_heads=H, head_dim=D, len_k=Lk)

    def _run(weight_mode):
        wkw = {} if weight_mode is None else {"pipeline_mode": weight_mode}

        def w_spec(shape):                    # grid-invariant (resident) block
            return pl.BlockSpec(shape, lambda b, qi: (0, 0), **wkw)

        return pl.pallas_call(
            kernel,
            out_shape=jax.ShapeDtypeStruct((B, Lq, C), jnp.bfloat16),
            grid_spec=pltpu.PrefetchScalarGridSpec(
                num_scalar_prefetch=0,
                grid=(B, n_q_tiles),
                in_specs=[
                    pl.BlockSpec((1, q_tile, C), lambda b, qi: (b, qi, 0)),   # x
                    pl.BlockSpec((1, lk_pad, HD), lambda b, qi: (b, 0, 0)),   # K
                    pl.BlockSpec((1, lk_pad, HD), lambda b, qi: (b, 0, 0)),   # V
                    w_spec((C, HD)),                                          # Wq
                    w_spec((1, HD)),                                          # bq
                    w_spec((HD, C)),                                          # Wout
                    w_spec((1, C)),                                           # b_out
                ],
                out_specs=pl.BlockSpec((1, q_tile, C), lambda b, qi: (b, qi, 0)),
                scratch_shapes=[pltpu.VMEM((q_tile, HD), jnp.bfloat16)],
            ),
            compiler_params=pltpu.CompilerParams(
                dimension_semantics=("parallel", "parallel"),
                vmem_limit_bytes=vmem_limit),
        )(x_bf, k, v, wq, bq, wo, bo)

    # Prefer single-buffered resident weights; fall back if Buffered(1) is
    # rejected by the installed Pallas/Mosaic version.
    buffered = getattr(pl, "Buffered", None)
    modes = ([buffered(1)] if buffered is not None else []) + [None]
    last_err = None
    for mode in modes:
        try:
            return _run(mode)
        except Exception as err:              # fallback to default buffering
            last_err = err
    raise last_err


def cross_attention_reference(x, embeds, params, *, num_heads, head_dim):
    """Pure-JAX f32 reference (same intended semantics, same literal q/scale)."""
    if embeds is None:
        embeds = x
    B, Lq, C = x.shape
    Lk = embeds.shape[1]
    H, D = num_heads, head_dim
    scale = head_dim ** (-0.5)
    q = (x @ params["wq"] + params["bq"]).reshape(B, Lq, H, D).transpose(0, 2, 1, 3)
    k = (embeds @ params["wk"] + params["bk"]).reshape(B, Lk, H, D).transpose(0, 2, 1, 3)
    v = (embeds @ params["wv"] + params["bv"]).reshape(B, Lk, H, D).transpose(0, 2, 1, 3)
    s = jnp.einsum("bhqd,bhkd->bhqk", q / scale, k)
    p = jax.nn.softmax(s, axis=-1)
    o = jnp.einsum("bhqk,bhkd->bhqd", p, v)
    o = o.transpose(0, 2, 1, 3).reshape(B, Lq, H * D)
    return o @ params["wo"] + params["bo"]


if __name__ == "__main__":
    # Small shapes consistent with the module's __init__.
    B = 2
    Lq = 16          # query sequence length (from x)
    Lk = 8           # key/value sequence length (from embeds)
    intermediate_dim = 32
    num_heads = 2
    head_dim = 16
    attn_dim = num_heads * head_dim

    key = jax.random.PRNGKey(0)
    keys = jax.random.split(key, 10)

    def init_linear(kw, kb, fan_in, fan_out):
        lim = 1.0 / (fan_in ** 0.5)
        w = jax.random.uniform(kw, (fan_in, fan_out), jnp.float32, -lim, lim)
        b = jax.random.uniform(kb, (fan_out,), jnp.float32, -lim, lim)
        return w, b

    wq, bq = init_linear(keys[0], keys[1], intermediate_dim, attn_dim)
    wk, bk = init_linear(keys[2], keys[3], intermediate_dim, attn_dim)
    wv, bv = init_linear(keys[4], keys[5], intermediate_dim, attn_dim)
    wo, bo = init_linear(keys[6], keys[7], attn_dim, intermediate_dim)
    params = dict(wq=wq, bq=bq, wk=wk, bk=bk, wv=wv, bv=bv, wo=wo, bo=bo)

    x = jax.random.normal(keys[8], (B, Lq, intermediate_dim), jnp.float32)
    embeds = jax.random.normal(keys[9], (B, Lk, intermediate_dim), jnp.float32)

    out = cross_attention(x, embeds, params, num_heads=num_heads, head_dim=head_dim)
    out = jax.block_until_ready(out)

    ref = cross_attention_reference(x, embeds, params,
                                    num_heads=num_heads, head_dim=head_dim)
    assert out.shape == (B, Lq, intermediate_dim)
    # bf16 operands + bf16 output (f32 accumulation) -> bf16-level tolerance.
    out_f32 = out.astype(jnp.float32)
    max_err = jnp.max(jnp.abs(out_f32 - ref))
    assert jnp.allclose(out_f32, ref, atol=4e-2, rtol=4e-2), \
        f"max abs err = {max_err}"

    print("KERNEL_OK")
</pallas_src>

<mosaic_0001>
module attributes {stable_mosaic.version = 11 : i64} {
  func.func @_cross_attention_kernel(%arg0: i32, %arg1: i32, %arg2: memref<1x16x32xbf16, #tpu.memory_space<vmem>>, %arg3: memref<1x128x32xbf16, #tpu.memory_space<vmem>>, %arg4: memref<1x128x32xbf16, #tpu.memory_space<vmem>>, %arg5: memref<32x32xbf16, #tpu.memory_space<vmem>>, %arg6: memref<1x32xf32, #tpu.memory_space<vmem>>, %arg7: memref<32x32xbf16, #tpu.memory_space<vmem>>, %arg8: memref<1x32xf32, #tpu.memory_space<vmem>>, %arg9: memref<1x16x32xbf16, #tpu.memory_space<vmem>>, %arg10: memref<16x32xbf16, #tpu.memory_space<vmem>>) attributes {dimension_semantics = [#tpu.dimension_semantics<parallel>, #tpu.dimension_semantics<parallel>], iteration_bounds = array<i64: 2, 1>, scalar_prefetch = 0 : i64, scratch_operands = 1 : i64, tpu.core_type = #tpu.core_type<tc>, window_params = [{transform_indices = @transform_0, window_bounds = array<i64: 1, 16, 32>}, {transform_indices = @transform_1, window_bounds = array<i64: 1, 128, 32>}, {transform_indices = @transform_2, window_bounds = array<i64: 1, 128, 32>}, {pipeline_mode = #tpu.pipeline_mode<synchronous>, transform_indices = @transform_3, window_bounds = array<i64: 32, 32>}, {pipeline_mode = #tpu.pipeline_mode<synchronous>, transform_indices = @transform_4, window_bounds = array<i64: 1, 32>}, {pipeline_mode = #tpu.pipeline_mode<synchronous>, transform_indices = @transform_5, window_bounds = array<i64: 32, 32>}, {pipeline_mode = #tpu.pipeline_mode<synchronous>, transform_indices = @transform_6, window_bounds = array<i64: 1, 32>}, {transform_indices = @transform_7, window_bounds = array<i64: 1, 16, 32>}]} {
    %c0 = arith.constant 0 : index
    %c0_0 = arith.constant 0 : index
    %c0_1 = arith.constant 0 : index
    %0 = vector.load %arg2[%c0, %c0_0, %c0_1] : memref<1x16x32xbf16, #tpu.memory_space<vmem>>, vector<1x16x32xbf16>
    %1 = vector.shape_cast %0 : vector<1x16x32xbf16> to vector<16x32xbf16>
    %c0_2 = arith.constant 0 : index
    %c0_3 = arith.constant 0 : index
    %c0_4 = arith.constant 0 : index
    %2 = vector.load %arg3[%c0_2, %c0_3, %c0_4] : memref<1x128x32xbf16, #tpu.memory_space<vmem>>, vector<1x128x32xbf16>
    %3 = vector.shape_cast %2 : vector<1x128x32xbf16> to vector<128x32xbf16>
    %c0_5 = arith.constant 0 : index
    %c0_6 = arith.constant 0 : index
    %c0_7 = arith.constant 0 : index
    %4 = vector.load %arg4[%c0_5, %c0_6, %c0_7] : memref<1x128x32xbf16, #tpu.memory_space<vmem>>, vector<1x128x32xbf16>
    %5 = vector.shape_cast %4 : vector<1x128x32xbf16> to vector<128x32xbf16>
    %c0_8 = arith.constant 0 : index
    %c0_9 = arith.constant 0 : index
    %6 = vector.load %arg5[%c0_8, %c0_9] : memref<32x32xbf16, #tpu.memory_space<vmem>>, vector<32x32xbf16>
    %cst = arith.constant dense<0.000000e+00> : vector<16x32xf32>
    %7 = tpu.matmul %1, %6, %cst {dimension_numbers = #tpu.dot_dimension_numbers<[1], [0], [0], [1], [0, 0, 1, 1], [], []>} : vector<16x32xbf16>, vector<32x32xbf16>, vector<16x32xf32> -> vector<16x32xf32>
    %c0_10 = arith.constant 0 : index
    %c0_11 = arith.constant 0 : index
    %8 = vector.load %arg6[%c0_10, %c0_11] : memref<1x32xf32, #tpu.memory_space<vmem>>, vector<1x32xf32>
    %9 = vector.broadcast %8 : vector<1x32xf32> to vector<16x32xf32>
    %10 = arith.addf %7, %9 : vector<16x32xf32>
    %11 = arith.truncf %10 : vector<16x32xf32> to vector<16x32xbf16>
    %12 = tpu.iota {dimensions = array<i32: 1>} : vector<1x128xi32>
    %c8_i32 = arith.constant 8 : i32
    %13 = vector.broadcast %c8_i32 : i32 to vector<1x128xi32>
    %14 = arith.cmpi slt, %12, %13 : vector<1x128xi32>
    %cst_12 = arith.constant 0.000000e+00 : f32
    %cst_13 = arith.constant -1.000000e+09 : f32
    %15 = vector.broadcast %cst_12 : f32 to vector<1x128xf32>
    %16 = vector.broadcast %cst_13 : f32 to vector<1x128xf32>
    %17 = arith.select %14, %15, %16 : vector<1x128xi1>, vector<1x128xf32>
    %18 = vector.extract_strided_slice %11 {offsets = [0, 0], sizes = [16, 16], strides = [1, 1]} : vector<16x32xbf16> to vector<16x16xbf16>
    %19 = vector.extract_strided_slice %3 {offsets = [0, 0], sizes = [128, 16], strides = [1, 1]} : vector<128x32xbf16> to vector<128x16xbf16>
    %cst_14 = arith.constant dense<0.000000e+00> : vector<16x128xf32>
    %20 = tpu.matmul %18, %19, %cst_14 {dimension_numbers = #tpu.dot_dimension_numbers<[1], [1], [0], [0], [0, 0, 1, 0], [], []>} : vector<16x16xbf16>, vector<128x16xbf16>, vector<16x128xf32> -> vector<16x128xf32>
    %21 = vector.broadcast %17 : vector<1x128xf32> to vector<16x128xf32>
    %22 = arith.addf %20, %21 : vector<16x128xf32>
    %cst_15 = arith.constant dense<0xFF800000> : vector<16xf32>
    %23 = vector.multi_reduction <maximumf>, %22, %cst_15 [1] : vector<16x128xf32> to vector<16xf32>
    %24 = vector.shape_cast %23 : vector<16xf32> to vector<16x1xf32>
    %25 = vector.broadcast %24 : vector<16x1xf32> to vector<16x128xf32>
    %26 = arith.subf %22, %25 : vector<16x128xf32>
    %27 = math.exp %26 : vector<16x128xf32>
    %cst_16 = arith.constant dense<0.000000e+00> : vector<16xf32>
    %28 = vector.multi_reduction <add>, %27, %cst_16 [1] : vector<16x128xf32> to vector<16xf32>
    %29 = vector.shape_cast %28 : vector<16xf32> to vector<16x1xf32>
    %30 = tpu.reciprocal %29 {approx = true} : vector<16x1xf32> -> vector<16x1xf32>
    %31 = vector.broadcast %30 : vector<16x1xf32> to vector<16x128xf32>
    %32 = arith.mulf %27, %31 : vector<16x128xf32>
    %33 = arith.truncf %32 : vector<16x128xf32> to vector<16x128xbf16>
    %34 = vector.extract_strided_slice %5 {offsets = [0, 0], sizes = [128, 16], strides = [1, 1]} : vector<128x32xbf16> to vector<128x16xbf16>
    %cst_17 = arith.constant dense<0.000000e+00> : vector<16x16xf32>
    %35 = tpu.matmul %33, %34, %cst_17 {dimension_numbers = #tpu.dot_dimension_numbers<[1], [0], [0], [1], [0, 0, 1, 1], [], []>} : vector<16x128xbf16>, vector<128x16xbf16>, vector<16x16xf32> -> vector<16x16xf32>
    %36 = arith.truncf %35 : vector<16x16xf32> to vector<16x16xbf16>
    %c0_18 = arith.constant 0 : index
    %c0_19 = arith.constant 0 : index
    %37 = vector.load %arg10[%c0_18, %c0_19] : memref<16x32xbf16, #tpu.memory_space<vmem>>, vector<16x16xbf16>
    tpu.vector_store %arg10[%c0_18, %c0_19], %36 {strides = array<i32>} : memref<16x32xbf16, #tpu.memory_space<vmem>>, vector<16x16xbf16>,
    %38 = vector.extract_strided_slice %11 {offsets = [0, 16], sizes = [16, 16], strides = [1, 1]} : vector<16x32xbf16> to vector<16x16xbf16>
    %39 = vector.extract_strided_slice %3 {offsets = [0, 16], sizes = [128, 16], strides = [1, 1]} : vector<128x32xbf16> to vector<128x16xbf16>
    %cst_20 = arith.constant dense<0.000000e+00> : vector<16x128xf32>
    %40 = tpu.matmul %38, %39, %cst_20 {dimension_numbers = #tpu.dot_dimension_numbers<[1], [1], [0], [0], [0, 0, 1, 0], [], []>} : vector<16x16xbf16>, vector<128x16xbf16>, vector<16x128xf32> -> vector<16x128xf32>
    %41 = vector.broadcast %17 : vector<1x128xf32> to vector<16x128xf32>
    %42 = arith.addf %40, %41 : vector<16x128xf32>
    %cst_21 = arith.constant dense<0xFF800000> : vector<16xf32>
    %43 = vector.multi_reduction <maximumf>, %42, %cst_21 [1] : vector<16x128xf32> to vector<16xf32>
    %44 = vector.shape_cast %43 : vector<16xf32> to vector<16x1xf32>
    %45 = vector.broadcast %44 : vector<16x1xf32> to vector<16x128xf32>
    %46 = arith.subf %42, %45 : vector<16x128xf32>
    %47 = math.exp %46 : vector<16x128xf32>
    %cst_22 = arith.constant dense<0.000000e+00> : vector<16xf32>
    %48 = vector.multi_reduction <add>, %47, %cst_22 [1] : vector<16x128xf32> to vector<16xf32>
    %49 = vector.shape_cast %48 : vector<16xf32> to vector<16x1xf32>
    %50 = tpu.reciprocal %49 {approx = true} : vector<16x1xf32> -> vector<16x1xf32>
    %51 = vector.broadcast %50 : vector<16x1xf32> to vector<16x128xf32>
    %52 = arith.mulf %47, %51 : vector<16x128xf32>
    %53 = arith.truncf %52 : vector<16x128xf32> to vector<16x128xbf16>
    %54 = vector.extract_strided_slice %5 {offsets = [0, 16], sizes = [128, 16], strides = [1, 1]} : vector<128x32xbf16> to vector<128x16xbf16>
    %cst_23 = arith.constant dense<0.000000e+00> : vector<16x16xf32>
    %55 = tpu.matmul %53, %54, %cst_23 {dimension_numbers = #tpu.dot_dimension_numbers<[1], [0], [0], [1], [0, 0, 1, 1], [], []>} : vector<16x128xbf16>, vector<128x16xbf16>, vector<16x16xf32> -> vector<16x16xf32>
    %56 = arith.truncf %55 : vector<16x16xf32> to vector<16x16xbf16>
    %c0_24 = arith.constant 0 : index
    %c16 = arith.constant 16 : index
    %57 = vector.load %arg10[%c0_24, %c16] : memref<16x32xbf16, #tpu.memory_space<vmem>>, vector<16x16xbf16>
    tpu.vector_store %arg10[%c0_24, %c16], %56 {strides = array<i32>} : memref<16x32xbf16, #tpu.memory_space<vmem>>, vector<16x16xbf16>,
    %c0_25 = arith.constant 0 : index
    %c0_26 = arith.constant 0 : index
    %58 = vector.load %arg10[%c0_25, %c0_26] : memref<16x32xbf16, #tpu.memory_space<vmem>>, vector<16x32xbf16>
    %c0_27 = arith.constant 0 : index
    %c0_28 = arith.constant 0 : index
    %59 = vector.load %arg7[%c0_27, %c0_28] : memref<32x32xbf16, #tpu.memory_space<vmem>>, vector<32x32xbf16>
    %cst_29 = arith.constant dense<0.000000e+00> : vector<16x32xf32>
    %60 = tpu.matmul %58, %59, %cst_29 {dimension_numbers = #tpu.dot_dimension_numbers<[1], [0], [0], [1], [0, 0, 1, 1], [], []>} : vector<16x32xbf16>, vector<32x32xbf16>, vector<16x32xf32> -> vector<16x32xf32>
    %c0_30 = arith.constant 0 : index
    %c0_31 = arith.constant 0 : index
    %61 = vector.load %arg8[%c0_30, %c0_31] : memref<1x32xf32, #tpu.memory_space<vmem>>, vector<1x32xf32>
    %62 = vector.broadcast %61 : vector<1x32xf32> to vector<16x32xf32>
    %63 = arith.addf %60, %62 : vector<16x32xf32>
    %64 = arith.truncf %63 : vector<16x32xf32> to vector<16x32xbf16>
    %c0_32 = arith.constant 0 : index
    %c0_33 = arith.constant 0 : index
    %c0_34 = arith.constant 0 : index
    %65 = vector.load %arg9[%c0_32, %c0_33, %c0_34] : memref<1x16x32xbf16, #tpu.memory_space<vmem>>, vector<1x16x32xbf16>
    %66 = vector.shape_cast %65 : vector<1x16x32xbf16> to vector<16x32xbf16>
    %67 = vector.shape_cast %64 : vector<16x32xbf16> to vector<1x16x32xbf16>
    tpu.vector_store %arg9[%c0_32, %c0_33, %c0_34], %67 {strides = array<i32>} : memref<1x16x32xbf16, #tpu.memory_space<vmem>>, vector<1x16x32xbf16>,
    return
  }
  func.func @transform_0(%arg0: i32, %arg1: i32) -> (i32, i32, i32) {
    %c0_i32 = arith.constant 0 : i32
    %c0_i32_0 = arith.constant 0 : i32
    return %arg0, %arg1, %c0_i32 : i32, i32, i32
  }
  func.func @transform_1(%arg0: i32, %arg1: i32) -> (i32, i32, i32) {
    %c0_i32 = arith.constant 0 : i32
    %c0_i32_0 = arith.constant 0 : i32
    %c0_i32_1 = arith.constant 0 : i32
    return %arg0, %c0_i32, %c0_i32_0 : i32, i32, i32
  }
  func.func @transform_2(%arg0: i32, %arg1: i32) -> (i32, i32, i32) {
    %c0_i32 = arith.constant 0 : i32
    %c0_i32_0 = arith.constant 0 : i32
    %c0_i32_1 = arith.constant 0 : i32
    return %arg0, %c0_i32, %c0_i32_0 : i32, i32, i32
  }
  func.func @transform_3(%arg0: i32, %arg1: i32) -> (i32, i32) {
    %c0_i32 = arith.constant 0 : i32
    %c0_i32_0 = arith.constant 0 : i32
    %c0_i32_1 = arith.constant 0 : i32
    return %c0_i32, %c0_i32_0 : i32, i32
  }
  func.func @transform_4(%arg0: i32, %arg1: i32) -> (i32, i32) {
    %c0_i32 = arith.constant 0 : i32
    %c0_i32_0 = arith.constant 0 : i32
    %c0_i32_1 = arith.constant 0 : i32
    return %c0_i32, %c0_i32_0 : i32, i32
  }
  func.func @transform_5(%arg0: i32, %arg1: i32) -> (i32, i32) {
    %c0_i32 = arith.constant 0 : i32
    %c0_i32_0 = arith.constant 0 : i32
    %c0_i32_1 = arith.constant 0 : i32
    return %c0_i32, %c0_i32_0 : i32, i32
  }
  func.func @transform_6(%arg0: i32, %arg1: i32) -> (i32, i32) {
    %c0_i32 = arith.constant 0 : i32
    %c0_i32_0 = arith.constant 0 : i32
    %c0_i32_1 = arith.constant 0 : i32
    return %c0_i32, %c0_i32_0 : i32, i32
  }
  func.func @transform_7(%arg0: i32, %arg1: i32) -> (i32, i32, i32) {
    %c0_i32 = arith.constant 0 : i32
    %c0_i32_0 = arith.constant 0 : i32
    return %arg0, %arg1, %c0_i32 : i32, i32, i32
  }
}

module attributes {stable_mosaic.version = 11 : i64} {
  func.func @_cross_attention_kernel(%arg0: i32, %arg1: i32, %arg2: memref<1x16x32xbf16, #tpu.memory_space<vmem>>, %arg3: memref<1x128x32xbf16, #tpu.memory_space<vmem>>, %arg4: memref<1x128x32xbf16, #tpu.memory_space<vmem>>, %arg5: memref<32x32xbf16, #tpu.memory_space<vmem>>, %arg6: memref<1x32xf32, #tpu.memory_space<vmem>>, %arg7: memref<32x32xbf16, #tpu.memory_space<vmem>>, %arg8: memref<1x32xf32, #tpu.memory_space<vmem>>, %arg9: memref<1x16x32xbf16, #tpu.memory_space<vmem>>, %arg10: memref<16x32xbf16, #tpu.memory_space<vmem>>) attributes {dimension_semantics = [#tpu.dimension_semantics<parallel>, #tpu.dimension_semantics<parallel>], iteration_bounds = array<i64: 2, 1>, scalar_prefetch = 0 : i64, scratch_operands = 1 : i64, tpu.core_type = #tpu.core_type<tc>, window_params = [{transform_indices = @transform_0, window_bounds = array<i64: 1, 16, 32>}, {transform_indices = @transform_1, window_bounds = array<i64: 1, 128, 32>}, {transform_indices = @transform_2, window_bounds = array<i64: 1, 128, 32>}, {pipeline_mode = #tpu.pipeline_mode<synchronous>, transform_indices = @transform_3, window_bounds = array<i64: 32, 32>}, {pipeline_mode = #tpu.pipeline_mode<synchronous>, transform_indices = @transform_4, window_bounds = array<i64: 1, 32>}, {pipeline_mode = #tpu.pipeline_mode<synchronous>, transform_indices = @transform_5, window_bounds = array<i64: 32, 32>}, {pipeline_mode = #tpu.pipeline_mode<synchronous>, transform_indices = @transform_6, window_bounds = array<i64: 1, 32>}, {transform_indices = @transform_7, window_bounds = array<i64: 1, 16, 32>}]} {
    %c0 = arith.constant 0 : index
    %c0_0 = arith.constant 0 : index
    %c0_1 = arith.constant 0 : index
    %0 = vector.load %arg2[%c0, %c0_0, %c0_1] : memref<1x16x32xbf16, #tpu.memory_space<vmem>>, vector<1x16x32xbf16>
    %1 = vector.shape_cast %0 : vector<1x16x32xbf16> to vector<16x32xbf16>
    %c0_2 = arith.constant 0 : index
    %c0_3 = arith.constant 0 : index
    %c0_4 = arith.constant 0 : index
    %2 = vector.load %arg3[%c0_2, %c0_3, %c0_4] : memref<1x128x32xbf16, #tpu.memory_space<vmem>>, vector<1x128x32xbf16>
    %3 = vector.shape_cast %2 : vector<1x128x32xbf16> to vector<128x32xbf16>
    %c0_5 = arith.constant 0 : index
    %c0_6 = arith.constant 0 : index
    %c0_7 = arith.constant 0 : index
    %4 = vector.load %arg4[%c0_5, %c0_6, %c0_7] : memref<1x128x32xbf16, #tpu.memory_space<vmem>>, vector<1x128x32xbf16>
    %5 = vector.shape_cast %4 : vector<1x128x32xbf16> to vector<128x32xbf16>
    %c0_8 = arith.constant 0 : index
    %c0_9 = arith.constant 0 : index
    %6 = vector.load %arg5[%c0_8, %c0_9] : memref<32x32xbf16, #tpu.memory_space<vmem>>, vector<32x32xbf16>
    %cst = arith.constant dense<0.000000e+00> : vector<16x32xf32>
    %7 = tpu.matmul %1, %6, %cst {dimension_numbers = #tpu.dot_dimension_numbers<[1], [0], [0], [1], [0, 0, 1, 1], [], []>} : vector<16x32xbf16>, vector<32x32xbf16>, vector<16x32xf32> -> vector<16x32xf32>
    %c0_10 = arith.constant 0 : index
    %c0_11 = arith.constant 0 : index
    %8 = vector.load %arg6[%c0_10, %c0_11] : memref<1x32xf32, #tpu.memory_space<vmem>>, vector<1x32xf32>
    %9 = vector.broadcast %8 : vector<1x32xf32> to vector<16x32xf32>
    %10 = arith.addf %7, %9 : vector<16x32xf32>
    %11 = arith.truncf %10 : vector<16x32xf32> to vector<16x32xbf16>
    %12 = tpu.iota {dimensions = array<i32: 1>} : vector<1x128xi32>
    %c8_i32 = arith.constant 8 : i32
    %13 = vector.broadcast %c8_i32 : i32 to vector<1x128xi32>
    %14 = arith.cmpi slt, %12, %13 : vector<1x128xi32>
    %cst_12 = arith.constant 0.000000e+00 : f32
    %cst_13 = arith.constant -1.000000e+09 : f32
    %15 = vector.broadcast %cst_12 : f32 to vector<1x128xf32>
    %16 = vector.broadcast %cst_13 : f32 to vector<1x128xf32>
    %17 = arith.select %14, %15, %16 : vector<1x128xi1>, vector<1x128xf32>
    %18 = vector.extract_strided_slice %11 {offsets = [0, 0], sizes = [16, 16], strides = [1, 1]} : vector<16x32xbf16> to vector<16x16xbf16>
    %19 = vector.extract_strided_slice %3 {offsets = [0, 0], sizes = [128, 16], strides = [1, 1]} : vector<128x32xbf16> to vector<128x16xbf16>
    %cst_14 = arith.constant dense<0.000000e+00> : vector<16x128xf32>
    %20 = tpu.matmul %18, %19, %cst_14 {dimension_numbers = #tpu.dot_dimension_numbers<[1], [1], [0], [0], [0, 0, 1, 0], [], []>} : vector<16x16xbf16>, vector<128x16xbf16>, vector<16x128xf32> -> vector<16x128xf32>
    %21 = vector.broadcast %17 : vector<1x128xf32> to vector<16x128xf32>
    %22 = arith.addf %20, %21 : vector<16x128xf32>
    %cst_15 = arith.constant dense<0xFF800000> : vector<16xf32>
    %23 = vector.multi_reduction <maximumf>, %22, %cst_15 [1] : vector<16x128xf32> to vector<16xf32>
    %24 = vector.shape_cast %23 : vector<16xf32> to vector<16x1xf32>
    %25 = vector.broadcast %24 : vector<16x1xf32> to vector<16x128xf32>
    %26 = arith.subf %22, %25 : vector<16x128xf32>
    %27 = math.exp %26 : vector<16x128xf32>
    %cst_16 = arith.constant dense<0.000000e+00> : vector<16xf32>
    %28 = vector.multi_reduction <add>, %27, %cst_16 [1] : vector<16x128xf32> to vector<16xf32>
    %29 = vector.shape_cast %28 : vector<16xf32> to vector<16x1xf32>
    %30 = tpu.reciprocal %29 {approx = true} : vector<16x1xf32> -> vector<16x1xf32>
    %31 = vector.broadcast %30 : vector<16x1xf32> to vector<16x128xf32>
    %32 = arith.mulf %27, %31 : vector<16x128xf32>
    %33 = arith.truncf %32 : vector<16x128xf32> to vector<16x128xbf16>
    %34 = vector.extract_strided_slice %5 {offsets = [0, 0], sizes = [128, 16], strides = [1, 1]} : vector<128x32xbf16> to vector<128x16xbf16>
    %cst_17 = arith.constant dense<0.000000e+00> : vector<16x16xf32>
    %35 = tpu.matmul %33, %34, %cst_17 {dimension_numbers = #tpu.dot_dimension_numbers<[1], [0], [0], [1], [0, 0, 1, 1], [], []>} : vector<16x128xbf16>, vector<128x16xbf16>, vector<16x16xf32> -> vector<16x16xf32>
    %36 = arith.truncf %35 : vector<16x16xf32> to vector<16x16xbf16>
    %c0_18 = arith.constant 0 : index
    %c0_19 = arith.constant 0 : index
    %37 = vector.load %arg10[%c0_18, %c0_19] : memref<16x32xbf16, #tpu.memory_space<vmem>>, vector<16x16xbf16>
    tpu.vector_store %arg10[%c0_18, %c0_19], %36 {strides = array<i32>} : memref<16x32xbf16, #tpu.memory_space<vmem>>, vector<16x16xbf16>,
    %38 = vector.extract_strided_slice %11 {offsets = [0, 16], sizes = [16, 16], strides = [1, 1]} : vector<16x32xbf16> to vector<16x16xbf16>
    %39 = vector.extract_strided_slice %3 {offsets = [0, 16], sizes = [128, 16], strides = [1, 1]} : vector<128x32xbf16> to vector<128x16xbf16>
    %cst_20 = arith.constant dense<0.000000e+00> : vector<16x128xf32>
    %40 = tpu.matmul %38, %39, %cst_20 {dimension_numbers = #tpu.dot_dimension_numbers<[1], [1], [0], [0], [0, 0, 1, 0], [], []>} : vector<16x16xbf16>, vector<128x16xbf16>, vector<16x128xf32> -> vector<16x128xf32>
    %41 = vector.broadcast %17 : vector<1x128xf32> to vector<16x128xf32>
    %42 = arith.addf %40, %41 : vector<16x128xf32>
    %cst_21 = arith.constant dense<0xFF800000> : vector<16xf32>
    %43 = vector.multi_reduction <maximumf>, %42, %cst_21 [1] : vector<16x128xf32> to vector<16xf32>
    %44 = vector.shape_cast %43 : vector<16xf32> to vector<16x1xf32>
    %45 = vector.broadcast %44 : vector<16x1xf32> to vector<16x128xf32>
    %46 = arith.subf %42, %45 : vector<16x128xf32>
    %47 = math.exp %46 : vector<16x128xf32>
    %cst_22 = arith.constant dense<0.000000e+00> : vector<16xf32>
    %48 = vector.multi_reduction <add>, %47, %cst_22 [1] : vector<16x128xf32> to vector<16xf32>
    %49 = vector.shape_cast %48 : vector<16xf32> to vector<16x1xf32>
    %50 = tpu.reciprocal %49 {approx = true} : vector<16x1xf32> -> vector<16x1xf32>
    %51 = vector.broadcast %50 : vector<16x1xf32> to vector<16x128xf32>
    %52 = arith.mulf %47, %51 : vector<16x128xf32>
    %53 = arith.truncf %52 : vector<16x128xf32> to vector<16x128xbf16>
    %54 = vector.extract_strided_slice %5 {offsets = [0, 16], sizes = [128, 16], strides = [1, 1]} : vector<128x32xbf16> to vector<128x16xbf16>
    %cst_23 = arith.constant dense<0.000000e+00> : vector<16x16xf32>
    %55 = tpu.matmul %53, %54, %cst_23 {dimension_numbers = #tpu.dot_dimension_numbers<[1], [0], [0], [1], [0, 0, 1, 1], [], []>} : vector<16x128xbf16>, vector<128x16xbf16>, vector<16x16xf32> -> vector<16x16xf32>
    %56 = arith.truncf %55 : vector<16x16xf32> to vector<16x16xbf16>
    %c0_24 = arith.constant 0 : index
    %c16 = arith.constant 16 : index
    %57 = vector.load %arg10[%c0_24, %c16] : memref<16x32xbf16, #tpu.memory_space<vmem>>, vector<16x16xbf16>
    tpu.vector_store %arg10[%c0_24, %c16], %56 {strides = array<i32>} : memref<16x32xbf16, #tpu.memory_space<vmem>>, vector<16x16xbf16>,
    %c0_25 = arith.constant 0 : index
    %c0_26 = arith.constant 0 : index
    %58 = vector.load %arg10[%c0_25, %c0_26] : memref<16x32xbf16, #tpu.memory_space<vmem>>, vector<16x32xbf16>
    %c0_27 = arith.constant 0 : index
    %c0_28 = arith.constant 0 : index
    %59 = vector.load %arg7[%c0_27, %c0_28] : memref<32x32xbf16, #tpu.memory_space<vmem>>, vector<32x32xbf16>
    %cst_29 = arith.constant dense<0.000000e+00> : vector<16x32xf32>
    %60 = tpu.matmul %58, %59, %cst_29 {dimension_numbers = #tpu.dot_dimension_numbers<[1], [0], [0], [1], [0, 0, 1, 1], [], []>} : vector<16x32xbf16>, vector<32x32xbf16>, vector<16x32xf32> -> vector<16x32xf32>
    %c0_30 = arith.constant 0 : index
    %c0_31 = arith.constant 0 : index
    %61 = vector.load %arg8[%c0_30, %c0_31] : memref<1x32xf32, #tpu.memory_space<vmem>>, vector<1x32xf32>
    %62 = vector.broadcast %61 : vector<1x32xf32> to vector<16x32xf32>
    %63 = arith.addf %60, %62 : vector<16x32xf32>
    %64 = arith.truncf %63 : vector<16x32xf32> to vector<16x32xbf16>
    %c0_32 = arith.constant 0 : index
    %c0_33 = arith.constant 0 : index
    %c0_34 = arith.constant 0 : index
    %65 = vector.load %arg9[%c0_32, %c0_33, %c0_34] : memref<1x16x32xbf16, #tpu.memory_space<vmem>>, vector<1x16x32xbf16>
    %66 = vector.shape_cast %65 : vector<1x16x32xbf16> to vector<16x32xbf16>
    %67 = vector.shape_cast %64 : vector<16x32xbf16> to vector<1x16x32xbf16>
    tpu.vector_store %arg9[%c0_32, %c0_33, %c0_34], %67 {strides = array<i32>} : memref<1x16x32xbf16, #tpu.memory_space<vmem>>, vector<1x16x32xbf16>,
    return
  }
  func.func @transform_0(%arg0: i32, %arg1: i32) -> (i32, i32, i32) {
    %c0_i32 = arith.constant 0 : i32
    %c0_i32_0 = arith.constant 0 : i32
    return %arg0, %arg1, %c0_i32 : i32, i32, i32
  }
  func.func @transform_1(%arg0: i32, %arg1: i32) -> (i32, i32, i32) {
    %c0_i32 = arith.constant 0 : i32
    %c0_i32_0 = arith.constant 0 : i32
    %c0_i32_1 = arith.constant 0 : i32
    return %arg0, %c0_i32, %c0_i32_0 : i32, i32, i32
  }
  func.func @transform_2(%arg0: i32, %arg1: i32) -> (i32, i32, i32) {
    %c0_i32 = arith.constant 0 : i32
    %c0_i32_0 = arith.constant 0 : i32
    %c0_i32_1 = arith.constant 0 : i32
    return %arg0, %c0_i32, %c0_i32_0 : i32, i32, i32
  }
  func.func @transform_3(%arg0: i32, %arg1: i32) -> (i32, i32) {
    %c0_i32 = arith.constant 0 : i32
    %c0_i32_0 = arith.constant 0 : i32
    %c0_i32_1 = arith.constant 0 : i32
    return %c0_i32, %c0_i32_0 : i32, i32
  }
  func.func @transform_4(%arg0: i32, %arg1: i32) -> (i32, i32) {
    %c0_i32 = arith.constant 0 : i32
    %c0_i32_0 = arith.constant 0 : i32
    %c0_i32_1 = arith.constant 0 : i32
    return %c0_i32, %c0_i32_0 : i32, i32
  }
  func.func @transform_5(%arg0: i32, %arg1: i32) -> (i32, i32) {
    %c0_i32 = arith.constant 0 : i32
    %c0_i32_0 = arith.constant 0 : i32
    %c0_i32_1 = arith.constant 0 : i32
    return %c0_i32, %c0_i32_0 : i32, i32
  }
  func.func @transform_6(%arg0: i32, %arg1: i32) -> (i32, i32) {
    %c0_i32 = arith.constant 0 : i32
    %c0_i32_0 = arith.constant 0 : i32
    %c0_i32_1 = arith.constant 0 : i32
    return %c0_i32, %c0_i32_0 : i32, i32
  }
  func.func @transform_7(%arg0: i32, %arg1: i32) -> (i32, i32, i32) {
    %c0_i32 = arith.constant 0 : i32
    %c0_i32_0 = arith.constant 0 : i32
    return %arg0, %arg1, %c0_i32 : i32, i32, i32
  }
}

</mosaic_0001>

<bundles_post_ra>
// kernel: tpu_custom_call.1
= control target key start
LH: loop header
LB: loop body
LE: loop exit
PB: predicated region body
PF: predicated region fallthrough
CT: control target
= control target key end

     0   :  { %12 = vsyncpa [#allocation4], 0  ;;  %s1418_s0 = inlined_call_operand.vmem [shape: bf16[2,16,32], index: 0, kind: input, shape index: {}]   ;;  %s1419_s1 = inlined_call_operand.vmem [shape: bf16[2,128,32], index: 1, kind: input, shape index: {}]   ;;  %s1420_s2 = inlined_call_operand.vmem [shape: bf16[2,128,32], index: 2, kind: input, shape index: {}]   ;;  %s1421_s3 = inlined_call_operand.vmem [shape: bf16[32,32], index: 3, kind: input, shape index: {}]   ;;  %s1422_s4 = inlined_call_operand.vmem [shape: f32[1,32], index: 4, kind: input, shape index: {}]   ;;  %s1423_s5 = inlined_call_operand.vmem [shape: bf16[32,32], index: 5, kind: input, shape index: {}]   ;;  %s1424_s6 = inlined_call_operand.vmem [shape: f32[1,32], index: 6, kind: input, shape index: {}]   ;;  %s1425_s7 = inlined_call_operand.hbm [shape: bf16[2,16,32], index: 7, kind: output, shape index: {}]  }
   0x1   :  { %14 = vsyncpa [#allocation4 + $0x1], 0  ;;  %s1242_s24 = smov 0   ;;  %s1244_s25 = smov 0  }
   0x2   :  { %s1246_s26 = smov 0   ;;  %s1248_s27 = smov 0  }
   0x3   :  { %s1250_s28 = smov 0   ;;  %s1252_s29 = smov 0  }
   0x4 LB: > { %s904_s30 = sadd.s32 4294967295, %s1195_s29   ;;  %s905_s8 = sadd.s32 4294967294, %s1195_s29   ;;  %s1195_s29 = sphi %s1252_s29, %s20_s29   ;;  %s1191_s28 = sphi %s1250_s28, %s1432_s28   ;;  %s1187_s27 = sphi %s1248_s27, %s1431_s27   ;;  %s1183_s26 = sphi %s1246_s26, %s1430_s26   ;;  %s1179_s25 = sphi %s1244_s25, %s1429_s25   ;;  %s1175_s24 = sphi %s1242_s24, %s1428_s24  }
   0x5   : > { %s32_s9 = sadd.s32 1, %s1191_s28  ;;  %s205_s10 = sadd.s32 1, %s1183_s26 }
   0x6   : > { %p34_p0 = scmp.ge.s32.totalorder %s32_s9, 2  ;;  %p215_p1 = scmp.ne.s32.totalorder %s1183_s26, %s1179_s25 }
   0x7   : > { %p216_p2 = scmp.eq.s32.totalorder %s904_s30, 1  ;;  %p221_p3 = scmp.ne.s32.totalorder %s1179_s25, %s1175_s24 }
   0x8   : > { %s1434_s9 = smov (%p34_p0, %s32_s9), 0  ;;  %p222_p5 = scmp.eq.s32.totalorder %s905_s8, 1 }
   0x9   : > { %p1282_p4 = por %p216_p2, %p215_p1  ;;  %s200_s12 = ssub.s32 %s1191_s28, %s1434_s9 }
   0xa   : > { %p908_p6 = scmp.ge.s32.totalorder %s1195_s29, 1  ;;  %p203_p7 = scmp.eq.s32.totalorder %s200_s12, 0 }
   0xb   : > { %p1289_p8 = por %p222_p5, %p221_p3  ;;  %p281_p9 = scmp.lt.s32.totalorder %s1195_s29, 3 }
   0xc   : > { %s1295_s14 = scalar_select %p203_p7, %s1183_s26, %s205_s10  }
   0xd   : > { %p282_p10 = pnand %p908_p6, %p281_p9 }
   0xe   : > { %p328_p11 = scmp.lt.s32.totalorder (!%p282_p10), %s1187_s27, 1  ;;  %s1197_s15 = smov (!%p282_p10), 112  }
   0xf   : > { %285 = sbr.rel (%p282_p10) target bundleno = 1065 (0x429), region = 48  ;;  %s324_s10 = sand.u32 (!%p282_p10), 1, %s1179_s25  }
  0x10   : > { %s909_s16 = sshll.u32 (!%p282_p10), %s324_s10, 3  ;;  %s1038_s17 = sshll.u32 (!%p282_p10), %s1187_s27, 3 }
  0x14   : > { %v1034_v0 = vld [vmem:[%s1421_s3 + $0x8] sm:$0xff]  ;;  %v1033_v1 = vld [vmem:[%s1421_s3] sm:$0xff]  ;;  %s1305_s19 = scalar_select %p328_p11, %s1187_s27, 1  ;;  %vm477_vm0 = vcmask 130048   ;;  %vm408_vm1 = vcmask 261120   ;;  %v428_v49 = vlaneseq  ;;  %vm602_vm3 = vcmask 125952  }
  0x15   : > { %418 = vmatpush.bf16.msra.mxu0 %v1034_v0  ;;  %v1099_v25 = vld [vmem:[%s1422_s4] ss:$0 sm:$0xff]  ;;  %v1198_v51 = vmov -1e+09   ;;  %vm731_vm4 = vcmask 257152   ;;  %vm780_vm5 = vcmask 257024  }
  0x16   : > { %s1013_s20 = sshll.u32 %s1305_s19, 3  ;;  %s1014_s21 = sshll.u32 %s1305_s19, 6  ;;  %v429_v50 = vand.u32 127, %v428_v49 }
  0x17   : > { %s335_s30 = scalar_lea.vmem %s1418_s0, %s1013_s20  ;;  %s341_s12 = scalar_lea.vmem %s1419_s1, %s1014_s21 }
  0x18   : > { %v1016_v2 = vld [vmem:[%s335_s30] sm:$0xff]  ;;  %v1024_v3 = vld [vmem:[%s341_s12 + $0x38] sm:$0xff]  ;;  %v1022_v4 = vld [vmem:[%s341_s12 + $0x28] sm:$0xff]  ;;  %s1353_s22 = scalar_lea.vmem %s1420_s2, %s1014_s21  ;;  %vm430_vm2 = vcmp.lt.s32.totalorder %v429_v50, 8  ;;  %s1199_s19 = smov 16  }
  0x19   : > { %419 = vmatpush.bf16.msra.mxu0 %v1033_v1  ;;  %621 = vrot.lane.b32.xlu0 %v1024_v3, %s1197_s15  ;;  %v503_v5 = vsel %vm477_vm0, %v1024_v3, 0  ;;  %v1020_v6 = vld [vmem:[%s341_s12 + $0x18] sm:$0xff]  ;;  %v1023_v7 = vld [vmem:[%s341_s12 + $0x30] sm:$0xff]  ;;  %v1021_v8 = vld [vmem:[%s341_s12 + $0x20] sm:$0xff]  ;;  %v497_v13 = vsel %vm477_vm0, %v1022_v4, 0  ;;  %v431_v52 = vsel %vm430_vm2, 0.0, %v1198_v51 }
  0x1a   : > { %617 = vrot.lane.b32.xlu1 %v1022_v4, %s1197_s15  ;;  %505 = vmatpush.bf16.xpose.msra.mxu1 %v503_v5  ;;  %v1019_v9 = vld [vmem:[%s341_s12 + $0x10] sm:$0xff]  ;;  %v500_v10 = vsel %vm477_vm0, %v1023_v7, 0  ;;  %v1018_v11 = vld [vmem:[%s341_s12 + $0x8] sm:$0xff]  ;;  %v1017_v12 = vld [vmem:[%s341_s12] sm:$0xff]  ;;  %v494_v14 = vsel %vm477_vm0, %v1021_v8, 0  ;;  %v491_v15 = vsel %vm477_vm0, %v1020_v6, 0 }
  0x1b   : > { %613 = vrot.lane.b32.xlu2 %v1020_v6, %s1197_s15  ;;  %v488_v16 = vsel %vm477_vm0, %v1019_v9, 0  ;;  %v485_v17 = vsel %vm477_vm0, %v1018_v11, 0  ;;  %v482_v18 = vsel %vm477_vm0, %v1017_v12, 0  ;;  %v1032_v46 = vld [vmem:[%s1353_s22 + $0x38] sm:$0xff]  ;;  %v1031_v47 = vld [vmem:[%s1353_s22 + $0x30] sm:$0xff]  ;;  %v1030_v59 = vld [vmem:[%s1353_s22 + $0x28] sm:$0xff] }
  0x1c   : > { %928 = vmatmul.msk.bf16.vlgmr.msra.gmra.mxu0 %vm408_vm1, %v1016_v2  ;;  %586 = vmatpush.bf16.msra.mxu2 %v1032_v46  ;;  %v1028_v48 = vld [vmem:[%s1353_s22 + $0x18] sm:$0xff]  ;;  %v1029_v61 = vld [vmem:[%s1353_s22 + $0x20] sm:$0xff]  ;;  %v1027_v63 = vld [vmem:[%s1353_s22 + $0x10] sm:$0xff]  ;;  %s784_s30 = scalar_lea.sflag [#allocation4], %s324_s10 }
  0x1d   : > { %v1026_v0 = vld [vmem:[%s1353_s22 + $0x8] sm:$0xff]  ;;  %v1025_v3 = vld [vmem:[%s1353_s22] sm:$0xff]  ;;  %s797_s22 = scalar_lea.hbm %s1425_s7, %s1038_s17 }
  0x1e   : > { %v1036_v50 = vld [vmem:[%s1423_s5] sm:$0xff]  ;;  %s800_s23 = sshll.u32 %s797_s22, 4  ;;  %s801_s23 = int_to_ptr.hbm [resolvable:$true] %s800_s23 }
  0x1f   : > { %s1131_s8 = sshra.s32 %s801_s23, 4  ;;  %s1132_s8 = int_to_ptr.hbm [resolvable:$true] %s1131_s8 }
  0x20   : > { %587 = vmatpush.bf16.msra.mxu2 %v1031_v47  ;;  %s1133_s27 = scalar_lea.hbm %s1132_s8, 8  ;;  %p1138_p1 = scmp.lt.s32.totalorder %s1132_s8, %s1425_s7 }
  0x21   : > { %619 = vrot.lane.b32.xlu0 %v1023_v7, %s1197_s15  ;;  %p1134_p12 = scmp.ne.s32.totalorder %s1132_s8, %s1133_s27 }
  0x22   : > { %615 = vrot.lane.b32.xlu1 %v1021_v8, %s1197_s15  ;;  %506 = vmatpush.bf16.xpose.msra.mxu1 %v500_v10 }
  0x23   : > { %611 = vrot.lane.b32.xlu2 %v1019_v9, %s1197_s15  ;;  %p1135_p13 = pnand %p1134_p12, %p1282_p4 }
  0x24   : > { %588 = vmatpush.bf16.msra.mxu2 %v1030_v59 }
  0x25   : > { %p1136_p0 = pneg %p1135_p13 }
  0x28   : > { %589 = vmatpush.bf16.msra.mxu2 %v1029_v61 }
  0x29   : > { %609 = vrot.lane.b32.xlu0 %v1018_v11, %s1197_s15 }
  0x2a   : > { %607 = vrot.lane.b32.xlu1 %v1017_v12, %s1197_s15  ;;  %507 = vmatpush.bf16.xpose.msra.mxu1 %v497_v13 }
  0x2c   : > { %590 = vmatpush.bf16.msra.mxu2 %v1028_v48 }
  0x30   : > { %591 = vmatpush.bf16.msra.mxu2 %v1027_v63 }
  0x31   : > { %697 = vrot.lane.b32.xlu0 %v1032_v46, %s1197_s15 }
  0x32   : > { %508 = vmatpush.bf16.xpose.msra.mxu1 %v494_v14  ;;  %695 = vrot.lane.b32.xlu1 %v1031_v47, %s1197_s15 }
  0x34   : > { %592 = vmatpush.bf16.msra.mxu2 %v1026_v0 }
  0x38   : > { %593 = vmatpush.bf16.msra.mxu2 %v1025_v3 }
  0x3a   : > { %509 = vmatpush.bf16.xpose.msra.mxu1 %v491_v15  ;;  %689 = vrot.lane.b32.xlu1 %v1028_v48, %s1197_s15  ;;  %v1037_v48 = vld [vmem:[%s1423_s5 + $0x8] sm:$0xff] }
  0x3c   : > { %770 = vmatpush.bf16.msrb.mxu2 %v1037_v48 }
  0x40   : > { %771 = vmatpush.bf16.msrb.mxu2 %v1036_v50 }
  0x42   : > { %510 = vmatpush.bf16.xpose.msra.mxu1 %v488_v16 }
  0x4a   : > { %511 = vmatpush.bf16.xpose.msra.mxu1 %v485_v17 }
  0x52   : > { %512 = vmatpush.bf16.xpose.msra.mxu1 %v482_v18 }
  0x75   : > { %v614_v36 = vpop.permute.xlu2 %613 }
  0x76   : > { %v636_v38 = vsel %vm477_vm0, %v614_v36, 0 }
  0x7d   : > { %v612_v39 = vpop.permute.xlu2 %611 }
  0x7e   : > { %v633_v40 = vsel %vm477_vm0, %v612_v39, 0 }
  0x8b   : > { %v622_v19 = vpop.permute.xlu0 %621 }
  0x8c   : > { %v648_v20 = vsel %vm477_vm0, %v622_v19, 0  ;;  %v618_v23 = vpop.permute.xlu1 %617 }
  0x8d   : > { %650 = vmatpush.bf16.xpose.msra.mxu3 %v648_v20  ;;  %v642_v26 = vsel %vm477_vm0, %v618_v23, 0 }
  0x93   : > { %v620_v21 = vpop.permute.xlu0 %619 }
  0x94   : > { %v645_v22 = vsel %vm477_vm0, %v620_v21, 0  ;;  %v616_v29 = vpop.permute.xlu1 %615 }
  0x95   : > { %651 = vmatpush.bf16.xpose.msra.mxu3 %v645_v22  ;;  %v639_v33 = vsel %vm477_vm0, %v616_v29, 0 }
  0x99   : > { %v421_v24 = vpop.f32.mrf.mxu0 }
  0x9a   : > { %v422_v27 = vadd.f32 %v1099_v25, %v421_v24 }
  0x9b   : > { %v610_v41 = vpop.permute.xlu0 %609 }
  0x9c   : > { %v426_v30 = vpack.c.bf16 %v422_v27, %v422_v27  ;;  %v630_v42 = vsel %vm477_vm0, %v610_v41, 0  ;;  %v608_v43 = vpop.permute.xlu1 %607 }
  0x9d   : > { %652 = vmatpush.bf16.xpose.msra.mxu3 %v642_v26  ;;  %v627_v44 = vsel %vm477_vm0, %v608_v43, 0 }
  0x9e   : > { %v434_v34 = vunpack.c.l.b16 %v426_v30 }
  0xa1   : > { %v423_v28 = vpop.f32.mrf.mxu0 }
  0xa2   : > { %v424_v31 = vadd.f32 %v1099_v25, %v423_v28 }
  0xa3   : > { %v698_v1 = vpop.permute.xlu0 %697 }
  0xa4   : > { %v427_v32 = vpack.c.bf16 %v424_v31, %v424_v31  ;;  %707 = vmatpush.bf16.msrb.mxu0 %v698_v1  ;;  %v696_v2 = vpop.permute.xlu1 %695 }
  0xa5   : > { %653 = vmatpush.bf16.xpose.msra.mxu3 %v639_v33 }
  0xa6   : > { %v435_v35 = vunpack.c.l.b16 %v427_v32 }
  0xa8   : > { %v436_v37 = vpack.c.b16 %v435_v35, %v434_v34  ;;  %708 = vmatpush.bf16.msrb.mxu0 %v696_v2 }
  0xaa   : > { %605 = vrot.lane.b32.xlu2 %v436_v37, %s1197_s15  ;;  %961 = vmatmul.msk.bf16.vlgmr.msra.gmra.mxu1 %vm477_vm0, %v436_v37 }
  0xac   : > { %v690_v10 = vpop.permute.xlu1 %689 }
  0xad   : > { %654 = vmatpush.bf16.xpose.msra.mxu3 %v636_v38 }
  0xb5   : > { %655 = vmatpush.bf16.xpose.msra.mxu3 %v633_v40 }
  0xbd   : > { %656 = vmatpush.bf16.xpose.msra.mxu3 %v630_v42 }
  0xc5   : > { %657 = vmatpush.bf16.xpose.msra.mxu3 %v627_v44 }
 0x104   : > { %v606_v45 = vpop.permute.xlu2 %605 }
 0x105   : > { %994 = vmatmul.msk.bf16.vlgmr.msra.gmra.mxu3 %vm477_vm0, %v606_v45 }
 0x127   : > { %v514_v53 = vpop.f32.mrf.mxu1 }
 0x128   : > { %v515_v54 = vadd.f32 %v514_v53, %v431_v52  ;;  %v1100_v53 = vld [vmem:[%s1424_s6] ss:$0 sm:$0xff] }
 0x12a   : > { %519 = vmax.xlane.f32.xlu2 %v515_v54 }
 0x12f   : > { %v516_v55 = vpop.f32.mrf.mxu1 }
 0x130   : > { %v517_v56 = vadd.f32 %v516_v55, %v431_v52 }
 0x132   : > { %521 = vmax.xlane.f32.xlu2 %v517_v56 }
 0x14a   : > { %693 = vrot.lane.b32.xlu2 %v1030_v59, %s1197_s15 }
 0x188   : > { %v659_v57 = vpop.f32.mrf.mxu3 }
 0x189   : > { %v660_v58 = vadd.f32 %v659_v57, %v431_v52 }
 0x18b   : > { %664 = vmax.xlane.f32.xlu0 %v660_v58 }
 0x190   : > { %v661_v60 = vpop.f32.mrf.mxu3 }
 0x191   : > { %v662_v62 = vadd.f32 %v661_v60, %v431_v52 }
 0x193   : > { %666 = vmax.xlane.f32.xlu1 %v662_v62 }
 0x19d   : > { %v520_v4 = vpop.xlane.xlu2 %519 }
 0x19e   : > { %v523_v5 = vsub.f32 %v515_v54, %v520_v4 }
 0x19f   : > { %691 = vrot.lane.b32.xlu0 %v1029_v61, %s1197_s15 }
 0x1a0   : > { %v525_v6 = vmul.f32 1.442695, %v523_v5 }
 0x1a2   : > { %1101 = vpow2.f32 %v525_v6 }
 0x1a5   : > { %v522_v7 = vpop.xlane.xlu2 %521 }
 0x1a6   : > { %v524_v14 = vsub.f32 %v517_v56, %v522_v7 }
 0x1a8   : > { %v1102_v8 = vpop.eup %1101  ;;  %v527_v15 = vmul.f32 1.442695, %v524_v14 }
 0x1ac   : > { %687 = vrot.lane.b32.xlu1 %v1027_v63, %s1197_s15 }
 0x1ad   : > { %v694_v9 = vpop.permute.xlu2 %693 }
 0x1ae   : > { %709 = vmatpush.bf16.msrb.mxu0 %v694_v9 }
 0x1b4   : > { %685 = vrot.lane.b32.xlu1 %v1026_v0, %s1197_s15 }
 0x1bc   : > { %683 = vrot.lane.b32.xlu1 %v1025_v3, %s1197_s15 }
 0x1e6   : > { %529 = vadd.xlane.f32.xlu1 %v1102_v8 }
 0x1fe   : > { %v665_v11 = vpop.xlane.xlu0 %664 }
 0x1ff   : > { %v668_v12 = vsub.f32 %v660_v58, %v665_v11 }
 0x201   : > { %v670_v13 = vmul.f32 1.442695, %v668_v12 }
 0x203   : > { %1103 = vpow2.f32 %v670_v13 }
 0x204   : > { %1105 = vpow2.f32 %v527_v15 }
 0x206   : > { %v667_v16 = vpop.xlane.xlu1 %666 }
 0x207   : > { %v669_v17 = vsub.f32 %v662_v62, %v667_v16 }
 0x209   : > { %v1104_v18 = vpop.eup %1103  ;;  %v672_v19 = vmul.f32 1.442695, %v669_v17 }
 0x20a   : > { %674 = vadd.xlane.f32.xlu0 %v1104_v18  ;;  %v1106_v20 = vpop.eup %1105 }
 0x20b   : > { %1107 = vpow2.f32 %v672_v19 }
 0x211   : > { %v1108_v21 = vpop.eup %1107  ;;  %v692_v22 = vpop.permute.xlu0 %691 }
 0x212   : > { %676 = vadd.xlane.f32.xlu2 %v1108_v21  ;;  %531 = vadd.xlane.f32.xlu0 %v1106_v20 }
 0x213   : > { %710 = vmatpush.bf16.msrb.mxu0 %v692_v22 }
 0x217   : > { %711 = vmatpush.bf16.msrb.mxu0 %v690_v10 }
 0x21e   : > { %v688_v23 = vpop.permute.xlu1 %687 }
 0x21f   : > { %712 = vmatpush.bf16.msrb.mxu0 %v688_v23 }
 0x226   : > { %v686_v24 = vpop.permute.xlu1 %685 }
 0x227   : > { %713 = vmatpush.bf16.msrb.mxu0 %v686_v24 }
 0x22e   : > { %v684_v25 = vpop.permute.xlu1 %683 }
 0x22f   : > { %714 = vmatpush.bf16.msrb.mxu0 %v684_v25 }
 0x259   : > { %v530_v27 = vpop.xlane.xlu1 %529 }
 0x25a   : > { %1109 = vrcp.f32 %v530_v27 }
 0x260   : > { %v1110_v30 = vpop.eup %1109 }
 0x261   : > { %v535_v34 = vmul.f32 %v1110_v30, %v1102_v8 }
 0x27d   : > { %v675_v26 = vpop.xlane.xlu0 %674 }
 0x27e   : > { %1111 = vrcp.f32 %v675_v26 }
 0x284   : > { %v1112_v31 = vpop.eup %1111 }
 0x285   : > { %v532_v28 = vpop.xlane.xlu0 %531  ;;  %v677_v29 = vpop.xlane.xlu2 %676  ;;  %v680_v36 = vmul.f32 %v1112_v31, %v1104_v18 }
 0x286   : > { %1113 = vrcp.f32 %v532_v28 }
 0x287   : > { %1115 = vrcp.f32 %v677_v29 }
 0x28c   : > { %v1114_v32 = vpop.eup %1113 }
 0x28d   : > { %v1116_v33 = vpop.eup %1115  ;;  %v536_v35 = vmul.f32 %v1114_v32, %v1106_v20 }
 0x28e   : > { %v681_v37 = vmul.f32 %v1116_v33, %v1108_v21 }
 0x28f   : > { %v537_v38 = vpack.c.bf16 %v536_v35, %v535_v34 }
 0x290   : > { %v682_v39 = vpack.c.bf16 %v681_v37, %v680_v36 }
 0x291   : > { %594 = vmatmul.bf16.vlgmr.msra.gmra.mxu2 %v537_v38 }
 0x292   : > { %715 = vmatmul.bf16.vlgmr.msrb.gmra.mxu0 %v682_v39 }
 0x30f   : > { %v716_v40 = vpop.f32.mrf.mxu0 }
 0x310   : > { %v721_v41 = vpack.c.bf16 %v716_v40, %v716_v40 }
 0x312   : > { %725 = vrot.lane.b32.xlu2 %v721_v41, %s1199_s19 }
 0x314   : > { %v595_v42 = vpop.f32.mrf.mxu2 }
 0x315   : > { %v600_v43 = vpack.c.bf16 %v595_v42, %v595_v42 }
 0x317   : > { %603 = vst.msk [vmem:[#allocation2] sm:$0xf] %vm602_vm3, %v600_v43  ;;  %v718_v44 = vpop.f32.mrf.mxu0 }
 0x318   : > { %v722_v45 = vpack.c.bf16 %v718_v44, %v718_v44 }
 0x31a   : > { %727 = vrot.lane.b32.xlu0 %v722_v45, %s1199_s19  ;;  %s326_s19 = scalar_lea.vmem [#allocation3], %s909_s16  ;;  %s1137_s16 = scalar_lea.hbm %s1425_s7, 16 }
 0x31b   : > { %s798_s21 = sshll.u32 %s326_s19, 4  ;;  %p1139_p2 = scmp.lt.s32.totalorder %s1137_s16, %s1133_s27  ;;  %s799_s21 = int_to_ptr.vmem [resolvable:$true] %s798_s21 }
 0x31c   : > { %v597_v46 = vpop.f32.mrf.mxu2 }
 0x31d   : > { %v601_v47 = vpack.c.bf16 %v597_v46, %v597_v46  ;;  %p1140_p3 = por %p1139_p2, %p1138_p1 }
 0x31f   : > { %604 = vst.msk [vmem:[#allocation2 + $0x4] sm:$0xf] %vm602_vm3, %v601_v47  ;;  %p1141_p5 = pnand %p1140_p3, %p1136_p0 }
 0x36c   : > { %v726_v49 = vpop.permute.xlu2 %725 }
 0x36d   : > { %732 = vst.msk [vmem:[#allocation2] sm:$0xf] %vm731_vm4, %v726_v49 }
 0x38c   : > { %v728_v51 = vpop.permute.xlu0 %727 }
 0x38d   : > { %733 = vst.msk [vmem:[#allocation2 + $0x4] sm:$0xf] %vm731_vm4, %v728_v51 }
 0x394   : > { %v1035_v52 = vld [vmem:[#allocation2] sm:$0xff] }
 0x395   : > { %1007 = vmatmul.msk.bf16.vlgmr.msrb.gmra.mxu2 %vm408_vm1, %v1035_v52 }
 0x418   : > { %v773_v54 = vpop.f32.mrf.mxu2 }
 0x419   : > { %v774_v55 = vadd.f32 %v1100_v53, %v773_v54 }
 0x41b   : > { %v778_v56 = vpack.c.bf16 %v774_v55, %v774_v55 }
 0x41d   : > { %781 = vst.msk [vmem:[%s326_s19] sm:$0xf] %vm780_vm5, %v778_v56 }
 0x420   : > { %v775_v57 = vpop.f32.mrf.mxu2 }
 0x421   : > { %v776_v58 = vadd.f32 %v1100_v53, %v775_v57 }
 0x423   : > { %v779_v59 = vpack.c.bf16 %v776_v58, %v776_v58 }
 0x425   : > { %782 = vst.msk [vmem:[%s326_s19 + $0x4] sm:$0xf] %vm780_vm5, %v779_v59 }
 0x426   : > { %1144 = shalt.err (!%p1141_p5)
}
 0x427   : > { %s1200_s10 = smov 64   ;;  %s1201_s20 = smov 4  }
 0x428   : > { %1039 = dma.vmem_to_hbm [thread:$0]  (%p1282_p4), %s799_s21, 128, %s801_s23, %s784_s30, %s1200_s10, %s1200_s10, %s1201_s20  }
 0x429 PF: > { %p1045_p6 = scmp.ge.s32.totalorder %s1195_s29, 2  ;;  %s815_s22 = sand.u32 1, %s1175_s24  }
 0x42a   : > { %s816_s19 = scalar_lea.sflag [#allocation4], %s815_s22 }
 0x42b   : > { %p1042_p7 = pnand %p1045_p6, %p1289_p8 }
 0x42d   : > { %p1043_p9 = pneg %p1042_p7 }
 0x42f   : > { %1170 = dma.done.wait (%p1043_p9), %s816_s19, 128  }
 0x430   : > { %1172 = vsyncadd (%p1043_p9), %s816_s19, 4294967168  ;;  %s20_s29 = sadd.s32 1, %s1195_s29   ;;  %s1428_s24 = smov %s1179_s25 }
 0x431   : > { %p17_p10 = scmp.ge.s32.totalorder %s20_s29, 4   ;;  %s1429_s25 = smov %s1183_s26 }
 0x432   : > { %s1430_s26 = smov %s1295_s14  ;;  %s1431_s27 = smov %s1191_s28 }
 0x433   : > { %s1432_s28 = smov %s1434_s9  ;;  %19 = sbr.rel (!%p17_p10) target bundleno = 4 (0x4), region = 89 }
 0x438   :  { %822 = vsyncpa [#allocation4], 1 }
 0x439   :  { %824 = vsyncpa [#allocation4 + $0x1], 1 }

// kernel: tpu_custom_call.1
= control target key start
LH: loop header
LB: loop body
LE: loop exit
PB: predicated region body
PF: predicated region fallthrough
CT: control target
= control target key end

     0   :  { %12 = vsyncpa [#allocation4], 0  ;;  %s1418_s0 = inlined_call_operand.vmem [shape: bf16[2,16,32], index: 0, kind: input, shape index: {}]   ;;  %s1419_s1 = inlined_call_operand.vmem [shape: bf16[2,128,32], index: 1, kind: input, shape index: {}]   ;;  %s1420_s2 = inlined_call_operand.vmem [shape: bf16[2,128,32], index: 2, kind: input, shape index: {}]   ;;  %s1421_s3 = inlined_call_operand.vmem [shape: bf16[32,32], index: 3, kind: input, shape index: {}]   ;;  %s1422_s4 = inlined_call_operand.vmem [shape: f32[1,32], index: 4, kind: input, shape index: {}]   ;;  %s1423_s5 = inlined_call_operand.vmem [shape: bf16[32,32], index: 5, kind: input, shape index: {}]   ;;  %s1424_s6 = inlined_call_operand.vmem [shape: f32[1,32], index: 6, kind: input, shape index: {}]   ;;  %s1425_s7 = inlined_call_operand.hbm [shape: bf16[2,16,32], index: 7, kind: output, shape index: {}]  }
   0x1   :  { %14 = vsyncpa [#allocation4 + $0x1], 0  ;;  %s1242_s24 = smov 0   ;;  %s1244_s25 = smov 0  }
   0x2   :  { %s1246_s26 = smov 0   ;;  %s1248_s27 = smov 0  }
   0x3   :  { %s1250_s28 = smov 0   ;;  %s1252_s29 = smov 0  }
   0x4 LB: > { %s904_s30 = sadd.s32 4294967295, %s1195_s29   ;;  %s905_s8 = sadd.s32 4294967294, %s1195_s29   ;;  %s1195_s29 = sphi %s1252_s29, %s20_s29   ;;  %s1191_s28 = sphi %s1250_s28, %s1432_s28   ;;  %s1187_s27 = sphi %s1248_s27, %s1431_s27   ;;  %s1183_s26 = sphi %s1246_s26, %s1430_s26   ;;  %s1179_s25 = sphi %s1244_s25, %s1429_s25   ;;  %s1175_s24 = sphi %s1242_s24, %s1428_s24  }
   0x5   : > { %s32_s9 = sadd.s32 1, %s1191_s28  ;;  %s205_s10 = sadd.s32 1, %s1183_s26 }
   0x6   : > { %p34_p0 = scmp.ge.s32.totalorder %s32_s9, 2  ;;  %p215_p1 = scmp.ne.s32.totalorder %s1183_s26, %s1179_s25 }
   0x7   : > { %p216_p2 = scmp.eq.s32.totalorder %s904_s30, 1  ;;  %p221_p3 = scmp.ne.s32.totalorder %s1179_s25, %s1175_s24 }
   0x8   : > { %s1434_s9 = smov (%p34_p0, %s32_s9), 0  ;;  %p222_p5 = scmp.eq.s32.totalorder %s905_s8, 1 }
   0x9   : > { %p1282_p4 = por %p216_p2, %p215_p1  ;;  %s200_s12 = ssub.s32 %s1191_s28, %s1434_s9 }
   0xa   : > { %p908_p6 = scmp.ge.s32.totalorder %s1195_s29, 1  ;;  %p203_p7 = scmp.eq.s32.totalorder %s200_s12, 0 }
   0xb   : > { %p1289_p8 = por %p222_p5, %p221_p3  ;;  %p281_p9 = scmp.lt.s32.totalorder %s1195_s29, 3 }
   0xc   : > { %s1295_s14 = scalar_select %p203_p7, %s1183_s26, %s205_s10  }
   0xd   : > { %p282_p10 = pnand %p908_p6, %p281_p9 }
   0xe   : > { %p328_p11 = scmp.lt.s32.totalorder (!%p282_p10), %s1187_s27, 1  ;;  %s1197_s15 = smov (!%p282_p10), 112  }
   0xf   : > { %285 = sbr.rel (%p282_p10) target bundleno = 1065 (0x429), region = 48  ;;  %s324_s10 = sand.u32 (!%p282_p10), 1, %s1179_s25  }
  0x10   : > { %s909_s16 = sshll.u32 (!%p282_p10), %s324_s10, 3  ;;  %s1038_s17 = sshll.u32 (!%p282_p10), %s1187_s27, 3 }
  0x14   : > { %v1034_v0 = vld [vmem:[%s1421_s3 + $0x8] sm:$0xff]  ;;  %v1033_v1 = vld [vmem:[%s1421_s3] sm:$0xff]  ;;  %s1305_s19 = scalar_select %p328_p11, %s1187_s27, 1  ;;  %vm477_vm0 = vcmask 130048   ;;  %vm408_vm1 = vcmask 261120   ;;  %v428_v49 = vlaneseq  ;;  %vm602_vm3 = vcmask 125952  }
  0x15   : > { %418 = vmatpush.bf16.msra.mxu0 %v1034_v0  ;;  %v1099_v25 = vld [vmem:[%s1422_s4] ss:$0 sm:$0xff]  ;;  %v1198_v51 = vmov -1e+09   ;;  %vm731_vm4 = vcmask 257152   ;;  %vm780_vm5 = vcmask 257024  }
  0x16   : > { %s1013_s20 = sshll.u32 %s1305_s19, 3  ;;  %s1014_s21 = sshll.u32 %s1305_s19, 6  ;;  %v429_v50 = vand.u32 127, %v428_v49 }
  0x17   : > { %s335_s30 = scalar_lea.vmem %s1418_s0, %s1013_s20  ;;  %s341_s12 = scalar_lea.vmem %s1419_s1, %s1014_s21 }
  0x18   : > { %v1016_v2 = vld [vmem:[%s335_s30] sm:$0xff]  ;;  %v1024_v3 = vld [vmem:[%s341_s12 + $0x38] sm:$0xff]  ;;  %v1022_v4 = vld [vmem:[%s341_s12 + $0x28] sm:$0xff]  ;;  %s1353_s22 = scalar_lea.vmem %s1420_s2, %s1014_s21  ;;  %vm430_vm2 = vcmp.lt.s32.totalorder %v429_v50, 8  ;;  %s1199_s19 = smov 16  }
  0x19   : > { %419 = vmatpush.bf16.msra.mxu0 %v1033_v1  ;;  %621 = vrot.lane.b32.xlu0 %v1024_v3, %s1197_s15  ;;  %v503_v5 = vsel %vm477_vm0, %v1024_v3, 0  ;;  %v1020_v6 = vld [vmem:[%s341_s12 + $0x18] sm:$0xff]  ;;  %v1023_v7 = vld [vmem:[%s341_s12 + $0x30] sm:$0xff]  ;;  %v1021_v8 = vld [vmem:[%s341_s12 + $0x20] sm:$0xff]  ;;  %v497_v13 = vsel %vm477_vm0, %v1022_v4, 0  ;;  %v431_v52 = vsel %vm430_vm2, 0.0, %v1198_v51 }
  0x1a   : > { %617 = vrot.lane.b32.xlu1 %v1022_v4, %s1197_s15  ;;  %505 = vmatpush.bf16.xpose.msra.mxu1 %v503_v5  ;;  %v1019_v9 = vld [vmem:[%s341_s12 + $0x10] sm:$0xff]  ;;  %v500_v10 = vsel %vm477_vm0, %v1023_v7, 0  ;;  %v1018_v11 = vld [vmem:[%s341_s12 + $0x8] sm:$0xff]  ;;  %v1017_v12 = vld [vmem:[%s341_s12] sm:$0xff]  ;;  %v494_v14 = vsel %vm477_vm0, %v1021_v8, 0  ;;  %v491_v15 = vsel %vm477_vm0, %v1020_v6, 0 }
  0x1b   : > { %613 = vrot.lane.b32.xlu2 %v1020_v6, %s1197_s15  ;;  %v488_v16 = vsel %vm477_vm0, %v1019_v9, 0  ;;  %v485_v17 = vsel %vm477_vm0, %v1018_v11, 0  ;;  %v482_v18 = vsel %vm477_vm0, %v1017_v12, 0  ;;  %v1032_v46 = vld [vmem:[%s1353_s22 + $0x38] sm:$0xff]  ;;  %v1031_v47 = vld [vmem:[%s1353_s22 + $0x30] sm:$0xff]  ;;  %v1030_v59 = vld [vmem:[%s1353_s22 + $0x28] sm:$0xff] }
  0x1c   : > { %928 = vmatmul.msk.bf16.vlgmr.msra.gmra.mxu0 %vm408_vm1, %v1016_v2  ;;  %586 = vmatpush.bf16.msra.mxu2 %v1032_v46  ;;  %v1028_v48 = vld [vmem:[%s1353_s22 + $0x18] sm:$0xff]  ;;  %v1029_v61 = vld [vmem:[%s1353_s22 + $0x20] sm:$0xff]  ;;  %v1027_v63 = vld [vmem:[%s1353_s22 + $0x10] sm:$0xff]  ;;  %s784_s30 = scalar_lea.sflag [#allocation4], %s324_s10 }
  0x1d   : > { %v1026_v0 = vld [vmem:[%s1353_s22 + $0x8] sm:$0xff]  ;;  %v1025_v3 = vld [vmem:[%s1353_s22] sm:$0xff]  ;;  %s797_s22 = scalar_lea.hbm %s1425_s7, %s1038_s17 }
  0x1e   : > { %v1036_v50 = vld [vmem:[%s1423_s5] sm:$0xff]  ;;  %s800_s23 = sshll.u32 %s797_s22, 4  ;;  %s801_s23 = int_to_ptr.hbm [resolvable:$true] %s800_s23 }
  0x1f   : > { %s1131_s8 = sshra.s32 %s801_s23, 4  ;;  %s1132_s8 = int_to_ptr.hbm [resolvable:$true] %s1131_s8 }
  0x20   : > { %587 = vmatpush.bf16.msra.mxu2 %v1031_v47  ;;  %s1133_s27 = scalar_lea.hbm %s1132_s8, 8  ;;  %p1138_p1 = scmp.lt.s32.totalorder %s1132_s8, %s1425_s7 }
  0x21   : > { %619 = vrot.lane.b32.xlu0 %v1023_v7, %s1197_s15  ;;  %p1134_p12 = scmp.ne.s32.totalorder %s1132_s8, %s1133_s27 }
  0x22   : > { %615 = vrot.lane.b32.xlu1 %v1021_v8, %s1197_s15  ;;  %506 = vmatpush.bf16.xpose.msra.mxu1 %v500_v10 }
  0x23   : > { %611 = vrot.lane.b32.xlu2 %v1019_v9, %s1197_s15  ;;  %p1135_p13 = pnand %p1134_p12, %p1282_p4 }
  0x24   : > { %588 = vmatpush.bf16.msra.mxu2 %v1030_v59 }
  0x25   : > { %p1136_p0 = pneg %p1135_p13 }
  0x28   : > { %589 = vmatpush.bf16.msra.mxu2 %v1029_v61 }
  0x29   : > { %609 = vrot.lane.b32.xlu0 %v1018_v11, %s1197_s15 }
  0x2a   : > { %607 = vrot.lane.b32.xlu1 %v1017_v12, %s1197_s15  ;;  %507 = vmatpush.bf16.xpose.msra.mxu1 %v497_v13 }
  0x2c   : > { %590 = vmatpush.bf16.msra.mxu2 %v1028_v48 }
  0x30   : > { %591 = vmatpush.bf16.msra.mxu2 %v1027_v63 }
  0x31   : > { %697 = vrot.lane.b32.xlu0 %v1032_v46, %s1197_s15 }
  0x32   : > { %508 = vmatpush.bf16.xpose.msra.mxu1 %v494_v14  ;;  %695 = vrot.lane.b32.xlu1 %v1031_v47, %s1197_s15 }
  0x34   : > { %592 = vmatpush.bf16.msra.mxu2 %v1026_v0 }
  0x38   : > { %593 = vmatpush.bf16.msra.mxu2 %v1025_v3 }
  0x3a   : > { %509 = vmatpush.bf16.xpose.msra.mxu1 %v491_v15  ;;  %689 = vrot.lane.b32.xlu1 %v1028_v48, %s1197_s15  ;;  %v1037_v48 = vld [vmem:[%s1423_s5 + $0x8] sm:$0xff] }
  0x3c   : > { %770 = vmatpush.bf16.msrb.mxu2 %v1037_v48 }
  0x40   : > { %771 = vmatpush.bf16.msrb.mxu2 %v1036_v50 }
  0x42   : > { %510 = vmatpush.bf16.xpose.msra.mxu1 %v488_v16 }
  0x4a   : > { %511 = vmatpush.bf16.xpose.msra.mxu1 %v485_v17 }
  0x52   : > { %512 = vmatpush.bf16.xpose.msra.mxu1 %v482_v18 }
  0x75   : > { %v614_v36 = vpop.permute.xlu2 %613 }
  0x76   : > { %v636_v38 = vsel %vm477_vm0, %v614_v36, 0 }
  0x7d   : > { %v612_v39 = vpop.permute.xlu2 %611 }
  0x7e   : > { %v633_v40 = vsel %vm477_vm0, %v612_v39, 0 }
  0x8b   : > { %v622_v19 = vpop.permute.xlu0 %621 }
  0x8c   : > { %v648_v20 = vsel %vm477_vm0, %v622_v19, 0  ;;  %v618_v23 = vpop.permute.xlu1 %617 }
  0x8d   : > { %650 = vmatpush.bf16.xpose.msra.mxu3 %v648_v20  ;;  %v642_v26 = vsel %vm477_vm0, %v618_v23, 0 }
  0x93   : > { %v620_v21 = vpop.permute.xlu0 %619 }
  0x94   : > { %v645_v22 = vsel %vm477_vm0, %v620_v21, 0  ;;  %v616_v29 = vpop.permute.xlu1 %615 }
  0x95   : > { %651 = vmatpush.bf16.xpose.msra.mxu3 %v645_v22  ;;  %v639_v33 = vsel %vm477_vm0, %v616_v29, 0 }
  0x99   : > { %v421_v24 = vpop.f32.mrf.mxu0 }
  0x9a   : > { %v422_v27 = vadd.f32 %v1099_v25, %v421_v24 }
  0x9b   : > { %v610_v41 = vpop.permute.xlu0 %609 }
  0x9c   : > { %v426_v30 = vpack.c.bf16 %v422_v27, %v422_v27  ;;  %v630_v42 = vsel %vm477_vm0, %v610_v41, 0  ;;  %v608_v43 = vpop.permute.xlu1 %607 }
  0x9d   : > { %652 = vmatpush.bf16.xpose.msra.mxu3 %v642_v26  ;;  %v627_v44 = vsel %vm477_vm0, %v608_v43, 0 }
  0x9e   : > { %v434_v34 = vunpack.c.l.b16 %v426_v30 }
  0xa1   : > { %v423_v28 = vpop.f32.mrf.mxu0 }
  0xa2   : > { %v424_v31 = vadd.f32 %v1099_v25, %v423_v28 }
  0xa3   : > { %v698_v1 = vpop.permute.xlu0 %697 }
  0xa4   : > { %v427_v32 = vpack.c.bf16 %v424_v31, %v424_v31  ;;  %707 = vmatpush.bf16.msrb.mxu0 %v698_v1  ;;  %v696_v2 = vpop.permute.xlu1 %695 }
  0xa5   : > { %653 = vmatpush.bf16.xpose.msra.mxu3 %v639_v33 }
  0xa6   : > { %v435_v35 = vunpack.c.l.b16 %v427_v32 }
  0xa8   : > { %v436_v37 = vpack.c.b16 %v435_v35, %v434_v34  ;;  %708 = vmatpush.bf16.msrb.mxu0 %v696_v2 }
  0xaa   : > { %605 = vrot.lane.b32.xlu2 %v436_v37, %s1197_s15  ;;  %961 = vmatmul.msk.bf16.vlgmr.msra.gmra.mxu1 %vm477_vm0, %v436_v37 }
  0xac   : > { %v690_v10 = vpop.permute.xlu1 %689 }
  0xad   : > { %654 = vmatpush.bf16.xpose.msra.mxu3 %v636_v38 }
  0xb5   : > { %655 = vmatpush.bf16.xpose.msra.mxu3 %v633_v40 }
  0xbd   : > { %656 = vmatpush.bf16.xpose.msra.mxu3 %v630_v42 }
  0xc5   : > { %657 = vmatpush.bf16.xpose.msra.mxu3 %v627_v44 }
 0x104   : > { %v606_v45 = vpop.permute.xlu2 %605 }
 0x105   : > { %994 = vmatmul.msk.bf16.vlgmr.msra.gmra.mxu3 %vm477_vm0, %v606_v45 }
 0x127   : > { %v514_v53 = vpop.f32.mrf.mxu1 }
 0x128   : > { %v515_v54 = vadd.f32 %v514_v53, %v431_v52  ;;  %v1100_v53 = vld [vmem:[%s1424_s6] ss:$0 sm:$0xff] }
 0x12a   : > { %519 = vmax.xlane.f32.xlu2 %v515_v54 }
 0x12f   : > { %v516_v55 = vpop.f32.mrf.mxu1 }
 0x130   : > { %v517_v56 = vadd.f32 %v516_v55, %v431_v52 }
 0x132   : > { %521 = vmax.xlane.f32.xlu2 %v517_v56 }
 0x14a   : > { %693 = vrot.lane.b32.xlu2 %v1030_v59, %s1197_s15 }
 0x188   : > { %v659_v57 = vpop.f32.mrf.mxu3 }
 0x189   : > { %v660_v58 = vadd.f32 %v659_v57, %v431_v52 }
 0x18b   : > { %664 = vmax.xlane.f32.xlu0 %v660_v58 }
 0x190   : > { %v661_v60 = vpop.f32.mrf.mxu3 }
 0x191   : > { %v662_v62 = vadd.f32 %v661_v60, %v431_v52 }
 0x193   : > { %666 = vmax.xlane.f32.xlu1 %v662_v62 }
 0x19d   : > { %v520_v4 = vpop.xlane.xlu2 %519 }
 0x19e   : > { %v523_v5 = vsub.f32 %v515_v54, %v520_v4 }
 0x19f   : > { %691 = vrot.lane.b32.xlu0 %v1029_v61, %s1197_s15 }
 0x1a0   : > { %v525_v6 = vmul.f32 1.442695, %v523_v5 }
 0x1a2   : > { %1101 = vpow2.f32 %v525_v6 }
 0x1a5   : > { %v522_v7 = vpop.xlane.xlu2 %521 }
 0x1a6   : > { %v524_v14 = vsub.f32 %v517_v56, %v522_v7 }
 0x1a8   : > { %v1102_v8 = vpop.eup %1101  ;;  %v527_v15 = vmul.f32 1.442695, %v524_v14 }
 0x1ac   : > { %687 = vrot.lane.b32.xlu1 %v1027_v63, %s1197_s15 }
 0x1ad   : > { %v694_v9 = vpop.permute.xlu2 %693 }
 0x1ae   : > { %709 = vmatpush.bf16.msrb.mxu0 %v694_v9 }
 0x1b4   : > { %685 = vrot.lane.b32.xlu1 %v1026_v0, %s1197_s15 }
 0x1bc   : > { %683 = vrot.lane.b32.xlu1 %v1025_v3, %s1197_s15 }
 0x1e6   : > { %529 = vadd.xlane.f32.xlu1 %v1102_v8 }
 0x1fe   : > { %v665_v11 = vpop.xlane.xlu0 %664 }
 0x1ff   : > { %v668_v12 = vsub.f32 %v660_v58, %v665_v11 }
 0x201   : > { %v670_v13 = vmul.f32 1.442695, %v668_v12 }
 0x203   : > { %1103 = vpow2.f32 %v670_v13 }
 0x204   : > { %1105 = vpow2.f32 %v527_v15 }
 0x206   : > { %v667_v16 = vpop.xlane.xlu1 %666 }
 0x207   : > { %v669_v17 = vsub.f32 %v662_v62, %v667_v16 }
 0x209   : > { %v1104_v18 = vpop.eup %1103  ;;  %v672_v19 = vmul.f32 1.442695, %v669_v17 }
 0x20a   : > { %674 = vadd.xlane.f32.xlu0 %v1104_v18  ;;  %v1106_v20 = vpop.eup %1105 }
 0x20b   : > { %1107 = vpow2.f32 %v672_v19 }
 0x211   : > { %v1108_v21 = vpop.eup %1107  ;;  %v692_v22 = vpop.permute.xlu0 %691 }
 0x212   : > { %676 = vadd.xlane.f32.xlu2 %v1108_v21  ;;  %531 = vadd.xlane.f32.xlu0 %v1106_v20 }
 0x213   : > { %710 = vmatpush.bf16.msrb.mxu0 %v692_v22 }
 0x217   : > { %711 = vmatpush.bf16.msrb.mxu0 %v690_v10 }
 0x21e   : > { %v688_v23 = vpop.permute.xlu1 %687 }
 0x21f   : > { %712 = vmatpush.bf16.msrb.mxu0 %v688_v23 }
 0x226   : > { %v686_v24 = vpop.permute.xlu1 %685 }
 0x227   : > { %713 = vmatpush.bf16.msrb.mxu0 %v686_v24 }
 0x22e   : > { %v684_v25 = vpop.permute.xlu1 %683 }
 0x22f   : > { %714 = vmatpush.bf16.msrb.mxu0 %v684_v25 }
 0x259   : > { %v530_v27 = vpop.xlane.xlu1 %529 }
 0x25a   : > { %1109 = vrcp.f32 %v530_v27 }
 0x260   : > { %v1110_v30 = vpop.eup %1109 }
 0x261   : > { %v535_v34 = vmul.f32 %v1110_v30, %v1102_v8 }
 0x27d   : > { %v675_v26 = vpop.xlane.xlu0 %674 }
 0x27e   : > { %1111 = vrcp.f32 %v675_v26 }
 0x284   : > { %v1112_v31 = vpop.eup %1111 }
 0x285   : > { %v532_v28 = vpop.xlane.xlu0 %531  ;;  %v677_v29 = vpop.xlane.xlu2 %676  ;;  %v680_v36 = vmul.f32 %v1112_v31, %v1104_v18 }
 0x286   : > { %1113 = vrcp.f32 %v532_v28 }
 0x287   : > { %1115 = vrcp.f32 %v677_v29 }
 0x28c   : > { %v1114_v32 = vpop.eup %1113 }
 0x28d   : > { %v1116_v33 = vpop.eup %1115  ;;  %v536_v35 = vmul.f32 %v1114_v32, %v1106_v20 }
 0x28e   : > { %v681_v37 = vmul.f32 %v1116_v33, %v1108_v21 }
 0x28f   : > { %v537_v38 = vpack.c.bf16 %v536_v35, %v535_v34 }
 0x290   : > { %v682_v39 = vpack.c.bf16 %v681_v37, %v680_v36 }
 0x291   : > { %594 = vmatmul.bf16.vlgmr.msra.gmra.mxu2 %v537_v38 }
 0x292   : > { %715 = vmatmul.bf16.vlgmr.msrb.gmra.mxu0 %v682_v39 }
 0x30f   : > { %v716_v40 = vpop.f32.mrf.mxu0 }
 0x310   : > { %v721_v41 = vpack.c.bf16 %v716_v40, %v716_v40 }
 0x312   : > { %725 = vrot.lane.b32.xlu2 %v721_v41, %s1199_s19 }
 0x314   : > { %v595_v42 = vpop.f32.mrf.mxu2 }
 0x315   : > { %v600_v43 = vpack.c.bf16 %v595_v42, %v595_v42 }
 0x317   : > { %603 = vst.msk [vmem:[#allocation2] sm:$0xf] %vm602_vm3, %v600_v43  ;;  %v718_v44 = vpop.f32.mrf.mxu0 }
 0x318   : > { %v722_v45 = vpack.c.bf16 %v718_v44, %v718_v44 }
 0x31a   : > { %727 = vrot.lane.b32.xlu0 %v722_v45, %s1199_s19  ;;  %s326_s19 = scalar_lea.vmem [#allocation3], %s909_s16  ;;  %s1137_s16 = scalar_lea.hbm %s1425_s7, 16 }
 0x31b   : > { %s798_s21 = sshll.u32 %s326_s19, 4  ;;  %p1139_p2 = scmp.lt.s32.totalorder %s1137_s16, %s1133_s27  ;;  %s799_s21 = int_to_ptr.vmem [resolvable:$true] %s798_s21 }
 0x31c   : > { %v597_v46 = vpop.f32.mrf.mxu2 }
 0x31d   : > { %v601_v47 = vpack.c.bf16 %v597_v46, %v597_v46  ;;  %p1140_p3 = por %p1139_p2, %p1138_p1 }
 0x31f   : > { %604 = vst.msk [vmem:[#allocation2 + $0x4] sm:$0xf] %vm602_vm3, %v601_v47  ;;  %p1141_p5 = pnand %p1140_p3, %p1136_p0 }
 0x36c   : > { %v726_v49 = vpop.permute.xlu2 %725 }
 0x36d   : > { %732 = vst.msk [vmem:[#allocation2] sm:$0xf] %vm731_vm4, %v726_v49 }
 0x38c   : > { %v728_v51 = vpop.permute.xlu0 %727 }
 0x38d   : > { %733 = vst.msk [vmem:[#allocation2 + $0x4] sm:$0xf] %vm731_vm4, %v728_v51 }
 0x394   : > { %v1035_v52 = vld [vmem:[#allocation2] sm:$0xff] }
 0x395   : > { %1007 = vmatmul.msk.bf16.vlgmr.msrb.gmra.mxu2 %vm408_vm1, %v1035_v52 }
 0x418   : > { %v773_v54 = vpop.f32.mrf.mxu2 }
 0x419   : > { %v774_v55 = vadd.f32 %v1100_v53, %v773_v54 }
 0x41b   : > { %v778_v56 = vpack.c.bf16 %v774_v55, %v774_v55 }
 0x41d   : > { %781 = vst.msk [vmem:[%s326_s19] sm:$0xf] %vm780_vm5, %v778_v56 }
 0x420   : > { %v775_v57 = vpop.f32.mrf.mxu2 }
 0x421   : > { %v776_v58 = vadd.f32 %v1100_v53, %v775_v57 }
 0x423   : > { %v779_v59 = vpack.c.bf16 %v776_v58, %v776_v58 }
 0x425   : > { %782 = vst.msk [vmem:[%s326_s19 + $0x4] sm:$0xf] %vm780_vm5, %v779_v59 }
 0x426   : > { %1144 = shalt.err (!%p1141_p5)
}
 0x427   : > { %s1200_s10 = smov 64   ;;  %s1201_s20 = smov 4  }
 0x428   : > { %1039 = dma.vmem_to_hbm [thread:$0]  (%p1282_p4), %s799_s21, 128, %s801_s23, %s784_s30, %s1200_s10, %s1200_s10, %s1201_s20  }
 0x429 PF: > { %p1045_p6 = scmp.ge.s32.totalorder %s1195_s29, 2  ;;  %s815_s22 = sand.u32 1, %s1175_s24  }
 0x42a   : > { %s816_s19 = scalar_lea.sflag [#allocation4], %s815_s22 }
 0x42b   : > { %p1042_p7 = pnand %p1045_p6, %p1289_p8 }
 0x42d   : > { %p1043_p9 = pneg %p1042_p7 }
 0x42f   : > { %1170 = dma.done.wait (%p1043_p9), %s816_s19, 128  }
 0x430   : > { %1172 = vsyncadd (%p1043_p9), %s816_s19, 4294967168  ;;  %s20_s29 = sadd.s32 1, %s1195_s29   ;;  %s1428_s24 = smov %s1179_s25 }
 0x431   : > { %p17_p10 = scmp.ge.s32.totalorder %s20_s29, 4   ;;  %s1429_s25 = smov %s1183_s26 }
 0x432   : > { %s1430_s26 = smov %s1295_s14  ;;  %s1431_s27 = smov %s1191_s28 }
 0x433   : > { %s1432_s28 = smov %s1434_s9  ;;  %19 = sbr.rel (!%p17_p10) target bundleno = 4 (0x4), region = 89 }
 0x438   :  { %822 = vsyncpa [#allocation4], 1 }
 0x439   :  { %824 = vsyncpa [#allocation4 + $0x1], 1 }

</bundles_post_ra>
